<compile_context>
chip_gen: v7x
topology: tpu7x:2x2x1
jax: 0.10.0
libtpu: 0.0.40
codegen_flags: <defaults>
</compile_context>

<pallas_src>
import jax
import jax.numpy as jnp
from jax.experimental import pallas as pl
from jax.experimental.pallas import tpu as pltpu

INPUT_SIZE = 2
HIDDEN_SIZE = 100
OUTPUT_SIZE = 10

HIDDEN_PAD = 128   # hidden width padded to a full 128-lane vreg row
OUT_SUB = 16       # output rows padded to a sublane-friendly multiple of 8

LANE = 128
TILE_MAX = 2048    # max batch (lane) tile; ~0.2 MiB/out-block, far below VMEM


def _round_up(n, m):
    return ((n + m - 1) // m) * m


def mlp_kernel(x_ref, w1_ref, b1_ref, w2_ref, b2_ref, o_ref):
    # x_ref : (2, tile_b)        batch on lanes
    # w1_ref: (128, 2)           hidden on sublanes
    # b1_ref: (128, 1)
    # w2_ref: (16, 128)          (out_pad, hidden_pad)
    # b2_ref: (16, 1)
    # o_ref : (16, tile_b)       batch on lanes, lane-dense unmasked store
    x = x_ref[...]

    # ---- Layer 1 on the VPU: K=2 -> two rank-1 FMAs (no MXU round trip).
    #      (128,1)*(1,tile_b) broadcasts -> (128, tile_b)
    h = (w1_ref[:, 0:1] * x[0:1, :]
         + w1_ref[:, 1:2] * x[1:2, :]
         + b1_ref[...])
    h = jnp.maximum(h, 0.0)                       # ReLU on the VPU

    # ---- Layer 2 on the MXU: (16,128) @ (128,tile_b), f32 accumulate.
    out = jnp.dot(w2_ref[...], h, preferred_element_type=jnp.float32)
    out = out + b2_ref[...]

    o_ref[...] = out.astype(o_ref.dtype)          # (16, tile_b) lane-dense


def prepare_params(w1, b1, w2, b2):
    """One-time prep: pad to lane/sublane-friendly sizes in transposed layout.

    Inputs follow PyTorch nn.Linear layout:
      w1: (HIDDEN, INPUT)  b1: (HIDDEN,)  w2: (OUTPUT, HIDDEN)  b2: (OUTPUT,)
    """
    w1_p = jnp.zeros((HIDDEN_PAD, INPUT_SIZE), jnp.float32)
    w1_p = w1_p.at[:HIDDEN_SIZE, :].set(w1.astype(jnp.float32))

    b1_p = jnp.zeros((HIDDEN_PAD, 1), jnp.float32)
    b1_p = b1_p.at[:HIDDEN_SIZE, 0].set(b1.astype(jnp.float32))

    # Padded hidden cols (100..127) and padded output rows (10..15) are zero
    # -> padded hidden contributes nothing, padded output rows are exactly 0.
    w2_p = jnp.zeros((OUT_SUB, HIDDEN_PAD), jnp.float32)
    w2_p = w2_p.at[:OUTPUT_SIZE, :HIDDEN_SIZE].set(w2.astype(jnp.float32))

    b2_p = jnp.zeros((OUT_SUB, 1), jnp.float32)
    b2_p = b2_p.at[:OUTPUT_SIZE, 0].set(b2.astype(jnp.float32))

    return w1_p, b1_p, w2_p, b2_p


def mlp_forward(x, params):
    """x: (B, INPUT_SIZE) f32; params from prepare_params. Returns (B, OUTPUT_SIZE)."""
    w1_p, b1_p, w2_p, b2_p = params
    B = x.shape[0]

    # Batch-tile policy: one grid step up to TILE_MAX rows; beyond that, split
    # as evenly as possible into ceil(B/TILE_MAX) lane-aligned tiles.
    b_lane = _round_up(B, LANE)
    num_tiles = max(1, -(-b_lane // TILE_MAX))           # ceil div
    tile_b = _round_up(-(-b_lane // num_tiles), LANE)
    b_pad = tile_b * num_tiles

    x_t = x.T.astype(jnp.float32)                        # (2, B), batch on lanes
    if b_pad != B:
        x_t = jnp.pad(x_t, ((0, 0), (0, b_pad - B)))     # skipped when B % 128 == 0

    out_t = pl.pallas_call(
        mlp_kernel,
        out_shape=jax.ShapeDtypeStruct((OUT_SUB, b_pad), jnp.float32),
        grid=(num_tiles,),
        in_specs=[
            pl.BlockSpec((INPUT_SIZE, tile_b), lambda i: (0, i)),
            # Weights / biases: constant block index -> VMEM-resident across
            # grid steps (no re-DMA per batch tile).
            pl.BlockSpec((HIDDEN_PAD, INPUT_SIZE), lambda i: (0, 0)),
            pl.BlockSpec((HIDDEN_PAD, 1), lambda i: (0, 0)),
            pl.BlockSpec((OUT_SUB, HIDDEN_PAD), lambda i: (0, 0)),
            pl.BlockSpec((OUT_SUB, 1), lambda i: (0, 0)),
        ],
        out_specs=pl.BlockSpec((OUT_SUB, tile_b), lambda i: (0, i)),
        compiler_params=pltpu.CompilerParams(
            dimension_semantics=("parallel",),   # shards multi-tile grids across TCs
        ),
    )(x_t, w1_p, b1_p, w2_p, b2_p)

    # Single tiny slice+transpose: (10, B) -> (B, 10). Padded batch lanes
    # (garbage) and padded output rows (zeros) are dropped here.
    return out_t[:OUTPUT_SIZE, :B].T


def init_params(key):
    """Deterministic init mimicking nn.Linear's uniform(-1/sqrt(fan_in), 1/sqrt(fan_in))."""
    k1, k2, k3, k4 = jax.random.split(key, 4)
    bound1 = 1.0 / jnp.sqrt(INPUT_SIZE)
    bound2 = 1.0 / jnp.sqrt(HIDDEN_SIZE)
    w1 = jax.random.uniform(k1, (HIDDEN_SIZE, INPUT_SIZE), jnp.float32, -bound1, bound1)
    b1 = jax.random.uniform(k2, (HIDDEN_SIZE,), jnp.float32, -bound1, bound1)
    w2 = jax.random.uniform(k3, (OUTPUT_SIZE, HIDDEN_SIZE), jnp.float32, -bound2, bound2)
    b2 = jax.random.uniform(k4, (OUTPUT_SIZE,), jnp.float32, -bound2, bound2)
    return w1, b1, w2, b2


if __name__ == "__main__":
    key = jax.random.PRNGKey(0)
    kx, kp = jax.random.split(key)
    batch = 8
    x = jax.random.normal(kx, (batch, INPUT_SIZE), jnp.float32)
    w1, b1, w2, b2 = init_params(kp)

    # One-time parameter prep (hoisted out of the per-call hot path).
    params = jax.block_until_ready(prepare_params(w1, b1, w2, b2))

    out = jax.block_until_ready(mlp_forward(x, params))

    # Reference check in plain JAX (same math as the PyTorch module).
    ref = jnp.maximum(x @ w1.T + b1, 0.0) @ w2.T + b2
    assert out.shape == (batch, OUTPUT_SIZE)
    assert jnp.allclose(out, ref, atol=1e-5, rtol=1e-5)
    print("KERNEL_OK")
</pallas_src>

<mosaic_0001>
module attributes {stable_mosaic.version = 11 : i64} {
  func.func @mlp_kernel(%arg0: i32, %arg1: memref<2x128xf32, #tpu.memory_space<vmem>>, %arg2: memref<128x2xf32, #tpu.memory_space<vmem>>, %arg3: memref<128x1xf32, #tpu.memory_space<vmem>>, %arg4: memref<16x128xf32, #tpu.memory_space<vmem>>, %arg5: memref<16x1xf32, #tpu.memory_space<vmem>>, %arg6: memref<16x128xf32, #tpu.memory_space<vmem>>) attributes {dimension_semantics = [#tpu.dimension_semantics<parallel>], iteration_bounds = array<i64: 1>, scalar_prefetch = 0 : i64, scratch_operands = 0 : i64, tpu.core_type = #tpu.core_type<tc>, window_params = [{transform_indices = @transform_0, window_bounds = array<i64: 2, 128>}, {pipeline_mode = #tpu.pipeline_mode<synchronous>, transform_indices = @transform_1, window_bounds = array<i64: 128, 2>}, {pipeline_mode = #tpu.pipeline_mode<synchronous>, transform_indices = @transform_2, window_bounds = array<i64: 128, 1>}, {pipeline_mode = #tpu.pipeline_mode<synchronous>, transform_indices = @transform_3, window_bounds = array<i64: 16, 128>}, {pipeline_mode = #tpu.pipeline_mode<synchronous>, transform_indices = @transform_4, window_bounds = array<i64: 16, 1>}, {transform_indices = @transform_5, window_bounds = array<i64: 16, 128>}]} {
    %c0 = arith.constant 0 : index
    %c0_0 = arith.constant 0 : index
    %0 = vector.load %arg1[%c0, %c0_0] : memref<2x128xf32, #tpu.memory_space<vmem>>, vector<2x128xf32>
    %c0_1 = arith.constant 0 : index
    %c0_2 = arith.constant 0 : index
    %1 = vector.load %arg2[%c0_1, %c0_2] : memref<128x2xf32, #tpu.memory_space<vmem>>, vector<128x1xf32>
    %2 = vector.extract_strided_slice %0 {offsets = [0, 0], sizes = [1, 128], strides = [1, 1]} : vector<2x128xf32> to vector<1x128xf32>
    %3 = vector.broadcast %1 : vector<128x1xf32> to vector<128x128xf32>
    %4 = vector.broadcast %2 : vector<1x128xf32> to vector<128x128xf32>
    %5 = arith.mulf %3, %4 : vector<128x128xf32>
    %c0_3 = arith.constant 0 : index
    %c1 = arith.constant 1 : index
    %6 = vector.load %arg2[%c0_3, %c1] : memref<128x2xf32, #tpu.memory_space<vmem>>, vector<128x1xf32>
    %7 = vector.extract_strided_slice %0 {offsets = [1, 0], sizes = [1, 128], strides = [1, 1]} : vector<2x128xf32> to vector<1x128xf32>
    %8 = vector.broadcast %6 : vector<128x1xf32> to vector<128x128xf32>
    %9 = vector.broadcast %7 : vector<1x128xf32> to vector<128x128xf32>
    %10 = arith.mulf %8, %9 : vector<128x128xf32>
    %11 = arith.addf %5, %10 : vector<128x128xf32>
    %c0_4 = arith.constant 0 : index
    %c0_5 = arith.constant 0 : index
    %12 = vector.load %arg3[%c0_4, %c0_5] : memref<128x1xf32, #tpu.memory_space<vmem>>, vector<128x1xf32>
    %13 = vector.broadcast %12 : vector<128x1xf32> to vector<128x128xf32>
    %14 = arith.addf %11, %13 : vector<128x128xf32>
    %cst = arith.constant 0.000000e+00 : f32
    %15 = vector.broadcast %cst : f32 to vector<128x128xf32>
    %16 = arith.maximumf %14, %15 : vector<128x128xf32>
    %c0_6 = arith.constant 0 : index
    %c0_7 = arith.constant 0 : index
    %17 = vector.load %arg4[%c0_6, %c0_7] : memref<16x128xf32, #tpu.memory_space<vmem>>, vector<16x128xf32>
    %cst_8 = arith.constant dense<0.000000e+00> : vector<16x128xf32>
    %18 = tpu.matmul %17, %16, %cst_8 {dimension_numbers = #tpu.dot_dimension_numbers<[1], [0], [0], [1], [0, 0, 1, 1], [], []>} : vector<16x128xf32>, vector<128x128xf32>, vector<16x128xf32> -> vector<16x128xf32>
    %c0_9 = arith.constant 0 : index
    %c0_10 = arith.constant 0 : index
    %19 = vector.load %arg5[%c0_9, %c0_10] : memref<16x1xf32, #tpu.memory_space<vmem>>, vector<16x1xf32>
    %20 = vector.broadcast %19 : vector<16x1xf32> to vector<16x128xf32>
    %21 = arith.addf %18, %20 : vector<16x128xf32>
    %c0_11 = arith.constant 0 : index
    %c0_12 = arith.constant 0 : index
    %22 = vector.load %arg6[%c0_11, %c0_12] : memref<16x128xf32, #tpu.memory_space<vmem>>, vector<16x128xf32>
    tpu.vector_store %arg6[%c0_11, %c0_12], %21 {strides = array<i32>} : memref<16x128xf32, #tpu.memory_space<vmem>>, vector<16x128xf32>,
    return
  }
  func.func @transform_0(%arg0: i32) -> (i32, i32) {
    %c0_i32 = arith.constant 0 : i32
    %c0_i32_0 = arith.constant 0 : i32
    return %c0_i32, %arg0 : i32, i32
  }
  func.func @transform_1(%arg0: i32) -> (i32, i32) {
    %c0_i32 = arith.constant 0 : i32
    %c0_i32_0 = arith.constant 0 : i32
    %c0_i32_1 = arith.constant 0 : i32
    return %c0_i32, %c0_i32_0 : i32, i32
  }
  func.func @transform_2(%arg0: i32) -> (i32, i32) {
    %c0_i32 = arith.constant 0 : i32
    %c0_i32_0 = arith.constant 0 : i32
    %c0_i32_1 = arith.constant 0 : i32
    return %c0_i32, %c0_i32_0 : i32, i32
  }
  func.func @transform_3(%arg0: i32) -> (i32, i32) {
    %c0_i32 = arith.constant 0 : i32
    %c0_i32_0 = arith.constant 0 : i32
    %c0_i32_1 = arith.constant 0 : i32
    return %c0_i32, %c0_i32_0 : i32, i32
  }
  func.func @transform_4(%arg0: i32) -> (i32, i32) {
    %c0_i32 = arith.constant 0 : i32
    %c0_i32_0 = arith.constant 0 : i32
    %c0_i32_1 = arith.constant 0 : i32
    return %c0_i32, %c0_i32_0 : i32, i32
  }
  func.func @transform_5(%arg0: i32) -> (i32, i32) {
    %c0_i32 = arith.constant 0 : i32
    %c0_i32_0 = arith.constant 0 : i32
    return %c0_i32, %arg0 : i32, i32
  }
}

</mosaic_0001>

<bundles_post_ra>
// kernel: tpu_custom_call.1
= control target key start
LH: loop header
LB: loop body
LE: loop exit
PB: predicated region body
PF: predicated region fallthrough
CT: control target
= control target key end

     0   :  { %v605_v2 = vmov 1   ;;  %v606_v7 = vmov 0   ;;  %s832_s0 = inlined_call_operand.vmem [shape: f32[2,128], index: 0, kind: input, shape index: {}]   ;;  %s833_s1 = inlined_call_operand.vmem [shape: f32[128,2], index: 1, kind: input, shape index: {}]   ;;  %s834_s2 = inlined_call_operand.vmem [shape: f32[128,1], index: 2, kind: input, shape index: {}]   ;;  %s835_s3 = inlined_call_operand.vmem [shape: f32[16,128], index: 3, kind: input, shape index: {}]   ;;  %s836_s4 = inlined_call_operand.vmem [shape: f32[16,1], index: 4, kind: input, shape index: {}]   ;;  %s837_s5 = inlined_call_operand.hbm [shape: f32[16,128], index: 5, kind: output, shape index: {}]  }
   0x1   :  { %v24_v0 = vld [vmem:[%s833_s1 + $0x10] sm:$0xff]  ;;  %v22_v1 = vld [vmem:[%s833_s1] sm:$0xff]  ;;  %565 = vset.pattern.permute.xlu0 %v605_v2  ;;  %563 = vset.pattern.permute.xlu1 %v605_v2  ;;  %v23_v4 = vld [vmem:[%s833_s1 + $0x8] sm:$0xff] }
   0x2   :  { %147 = vperm.xlu0 %565, %v24_v0   ;;  %139 = vperm.xlu1 %563, %v22_v1   ;;  %v26_v3 = vld [vmem:[%s833_s1 + $0x20] sm:$0xff]  ;;  %v28_v5 = vld [vmem:[%s833_s1 + $0x30] sm:$0xff]  ;;  %v25_v6 = vld [vmem:[%s833_s1 + $0x18] sm:$0xff] }
   0x3   :  { %v30_v8 = vld [vmem:[%s833_s1 + $0x40] sm:$0xff] }
   0x6   :  { %155 = vperm.xlu0 %565, %v26_v3   ;;  %143 = vperm.xlu1 %563, %v23_v4  }
   0xa   :  { %163 = vperm.xlu0 %565, %v28_v5   ;;  %564 = vset.pattern.permute.xlu1 %v606_v7 }
   0xb   :  { %55 = vperm.xlu1 %564, %v25_v6  }
   0xc   :  { %10 = vsyncpa [#allocation3], 0  ;;  %v32_v9 = vld [vmem:[%s833_s1 + $0x50] sm:$0xff]  ;;  %v238_v10 = vld [vmem:[%s834_s2] sm:$0xff]  ;;  %v118_v46 = vlaneseq  ;;  %s607_s13 = smov [#allocation2]  }
   0xd   :  { %v34_v11 = vld [vmem:[%s833_s1 + $0x60] sm:$0xff]  ;;  %v36_v12 = vld [vmem:[%s833_s1 + $0x70] sm:$0xff]  ;;  %v27_v13 = vld [vmem:[%s833_s1 + $0x28] sm:$0xff]  ;;  %s462_s14 = sshll.u32 %s607_s13, 4  ;;  %s463_s14 = int_to_ptr.vmem [resolvable:$true] %s462_s14 }
   0xe   :  { %171 = vperm.xlu0 %565, %v30_v8   ;;  %v240_v14 = vld [vmem:[%s834_s2 + $0x10] sm:$0xff]  ;;  %v239_v15 = vld [vmem:[%s834_s2 + $0x8] sm:$0xff]  ;;  %v241_v16 = vld [vmem:[%s834_s2 + $0x18] sm:$0xff]  ;;  %v119_v49 = vshrl.u32 %v118_v46, 7  ;;  %s581_s15 = scalar_lea.vmem %s463_s14, 256  ;;  %p586_p1 = scmp.lt.s32.totalorder %s463_s14, %s463_s14 }
   0xf   :  { %566 = vset.pattern.permute.xlu1 %v605_v2  ;;  %v29_v17 = vld [vmem:[%s833_s1 + $0x38] sm:$0xff]  ;;  %v243_v18 = vld [vmem:[%s834_s2 + $0x28] sm:$0xff]  ;;  %v242_v20 = vld [vmem:[%s834_s2 + $0x20] sm:$0xff]  ;;  %p582_p0 = scmp.ne.s32.totalorder %s463_s14, %s581_s15  ;;  %p587_p2 = scmp.lt.s32.totalorder %s581_s15, %s581_s15 }
  0x10   :  { %151 = vperm.xlu1 %566, %v25_v6   ;;  %v245_v19 = vld [vmem:[%s834_s2 + $0x38] sm:$0xff]  ;;  %v247_v21 = vld [vmem:[%s834_s2 + $0x48] sm:$0xff]  ;;  %v368_v25 = vld [vmem:[%s836_s4] sm:$0xff]  ;;  %v204_v52 = vsub.s32 1, %v119_v49  ;;  %v120_v53 = vsub.s32 0, %v119_v49 }
  0x11   :  { %v249_v22 = vld [vmem:[%s834_s2 + $0x58] sm:$0xff]  ;;  %v31_v23 = vld [vmem:[%s833_s1 + $0x48] sm:$0xff]  ;;  %v244_v26 = vld [vmem:[%s834_s2 + $0x30] sm:$0xff]  ;;  %p588_p3 = por %p587_p2, %p586_p1 }
  0x12   :  { %179 = vperm.xlu0 %565, %v32_v9   ;;  %v251_v24 = vld [vmem:[%s834_s2 + $0x68] sm:$0xff]  ;;  %v33_v27 = vld [vmem:[%s833_s1 + $0x58] sm:$0xff]  ;;  %v246_v28 = vld [vmem:[%s834_s2 + $0x40] sm:$0xff] }
  0x13   :  { %v35_v29 = vld [vmem:[%s833_s1 + $0x68] sm:$0xff]  ;;  %v248_v30 = vld [vmem:[%s834_s2 + $0x50] sm:$0xff]  ;;  %v37_v31 = vld [vmem:[%s833_s1 + $0x78] sm:$0xff]  ;;  %p589_p4 = pnand %p588_p3, %p582_p0 }
  0x14   :  { %567 = vset.pattern.permute.xlu1 %v606_v7  ;;  %v250_v32 = vld [vmem:[%s834_s2 + $0x60] sm:$0xff]  ;;  %v252_v35 = vld [vmem:[%s834_s2 + $0x70] sm:$0xff]  ;;  %v253_v38 = vld [vmem:[%s834_s2 + $0x78] sm:$0xff] }
  0x15   :  { %256 = vperm.xlu1 %567, %v238_v10   ;;  %v369_v41 = vld [vmem:[%s836_s4 + $0x8] sm:$0xff]  ;;  %v366_v44 = vld [vmem:[%s835_s3] sm:$0xff] }
  0x16   :  { %187 = vperm.xlu0 %565, %v34_v11   ;;  %523 = vmatprep.mubr.f32.mxu0 %v366_v44  ;;  %v21_v54 = vld [vmem:[%s832_s0] sm:$0x3] }
  0x17   :  { %v776_v57 = vrot.slane %v21_v54, %v204_v52  ;;  %v778_v58 = vrot.slane %v21_v54, %v120_v53 }
  0x19   :  { %60 = vperm.xlu1 %567, %v26_v3  }
  0x1a   :  { %195 = vperm.xlu0 %565, %v36_v12  }
  0x1d   :  { %65 = vperm.xlu1 %567, %v27_v13  }
  0x1e   :  { %578 = vset.pattern.permute.xlu0 %v606_v7 }
  0x1f   :  { %40 = vperm.xlu0 %578, %v22_v1  }
  0x21   :  { %568 = vset.pattern.permute.xlu1 %v605_v2 }
  0x22   :  { %159 = vperm.xlu1 %568, %v27_v13  }
  0x23   :  { %45 = vperm.xlu0 %578, %v23_v4  }
  0x26   :  { %569 = vset.pattern.permute.xlu1 %v606_v7 }
  0x27   :  { %50 = vperm.xlu0 %578, %v24_v0   ;;  %266 = vperm.xlu1 %569, %v240_v14  }
  0x2b   :  { %261 = vperm.xlu0 %578, %v239_v15   ;;  %70 = vperm.xlu1 %569, %v28_v5  }
  0x2f   :  { %271 = vperm.xlu0 %578, %v241_v16   ;;  %75 = vperm.xlu1 %569, %v29_v17  }
  0x33   :  { %281 = vperm.xlu0 %578, %v243_v18   ;;  %570 = vset.pattern.permute.xlu1 %v605_v2 }
  0x34   :  { %167 = vperm.xlu1 %570, %v29_v17  }
  0x37   :  { %291 = vperm.xlu0 %578, %v245_v19  }
  0x38   :  { %571 = vset.pattern.permute.xlu1 %v606_v7 }
  0x39   :  { %276 = vperm.xlu1 %571, %v242_v20  }
  0x3b   :  { %301 = vperm.xlu0 %578, %v247_v21  }
  0x3d   :  { %80 = vperm.xlu1 %571, %v30_v8  }
  0x3f   :  { %311 = vperm.xlu0 %578, %v249_v22  }
  0x41   :  { %85 = vperm.xlu1 %571, %v31_v23  }
  0x43   :  { %321 = vperm.xlu0 %578, %v251_v24  }
  0x45   :  { %572 = vset.pattern.permute.xlu1 %v605_v2 }
  0x46   :  { %175 = vperm.xlu1 %572, %v31_v23  }
  0x47   :  { %372 = vperm.xlu0 %578, %v368_v25  }
  0x4a   :  { %573 = vset.pattern.permute.xlu1 %v606_v7 }
  0x4b   :  { %286 = vperm.xlu1 %573, %v244_v26  }
  0x4f   :  { %90 = vperm.xlu1 %573, %v32_v9  }
  0x53   :  { %95 = vperm.xlu1 %573, %v33_v27  }
  0x57   :  { %574 = vset.pattern.permute.xlu1 %v605_v2 }
  0x58   :  { %183 = vperm.xlu1 %574, %v33_v27  }
  0x5c   :  { %575 = vset.pattern.permute.xlu1 %v606_v7 }
  0x5d   :  { %296 = vperm.xlu1 %575, %v246_v28  }
  0x61   :  { %100 = vperm.xlu1 %575, %v34_v11  }
  0x65   :  { %105 = vperm.xlu1 %575, %v35_v29  }
  0x69   :  { %576 = vset.pattern.permute.xlu1 %v605_v2 }
  0x6a   :  { %191 = vperm.xlu1 %576, %v35_v29  }
  0x6e   :  { %577 = vset.pattern.permute.xlu1 %v606_v7 }
  0x6f   :  { %306 = vperm.xlu1 %577, %v248_v30  }
  0x73   :  { %110 = vperm.xlu1 %577, %v36_v12  }
  0x77   :  { %115 = vperm.xlu1 %577, %v37_v31  }
  0x7b   :  { %579 = vset.pattern.permute.xlu1 %v605_v2 }
  0x7c   :  { %199 = vperm.xlu1 %579, %v37_v31  }
  0x80   :  { %580 = vset.pattern.permute.xlu1 %v606_v7 }
  0x81   :  { %316 = vperm.xlu1 %580, %v250_v32   ;;  %v140_v33 = vpop.permute.xlu1 %139  ;;  %v148_v34 = vpop.permute.xlu0 %147 }
  0x82   :  { %v206_v62 = vmul.f32 %v776_v57, %v140_v33  ;;  %v208_v63 = vmul.f32 %v776_v57, %v148_v34 }
  0x85   :  { %326 = vperm.xlu1 %580, %v252_v35   ;;  %v144_v36 = vpop.permute.xlu1 %143  ;;  %v156_v37 = vpop.permute.xlu0 %155 }
  0x86   :  { %v207_v4 = vmul.f32 %v776_v57, %v144_v36  ;;  %v210_v25 = vmul.f32 %v776_v57, %v156_v37 }
  0x89   :  { %331 = vperm.xlu1 %580, %v253_v38   ;;  %v757_v39 = vpop.permute.xlu0 %163 }
  0x8a   :  { %v56_v40 = vpop.permute.xlu1 %55  ;;  %v212_v46 = vmul.f32 %v776_v57, %v757_v39 }
  0x8b   :  { %v125_v12 = vmul.f32 %v778_v58, %v56_v40 }
  0x8d   :  { %377 = vperm.xlu1 %580, %v369_v41   ;;  %v762_v42 = vpop.permute.xlu0 %171 }
  0x8f   :  { %v152_v43 = vpop.permute.xlu1 %151 }
  0x90   :  { %v209_v6 = vmul.f32 %v776_v57, %v152_v43 }
  0x91   :  { %v767_v45 = vpop.permute.xlu0 %179 }
  0x92   :  { %v225_v16 = vadd.f32 %v209_v6, %v125_v12 }
  0x94   :  { %v257_v47 = vpop.permute.xlu1 %256 }
  0x95   :  { %v769_v48 = vpop.permute.xlu0 %187 }
  0x98   :  { %v61_v50 = vpop.permute.xlu1 %60 }
  0x99   :  { %v771_v51 = vpop.permute.xlu0 %195  ;;  %v126_v26 = vmul.f32 %v778_v58, %v61_v50 }
  0x9b   :  { %v226_v33 = vadd.f32 %v210_v25, %v126_v26 }
  0x9c   :  { %v66_v55 = vpop.permute.xlu1 %65 }
  0x9d   :  { %v127_v27 = vmul.f32 %v778_v58, %v66_v55 }
  0x9e   :  { %v41_v56 = vpop.permute.xlu0 %40 }
  0x9f   :  { %v122_v59 = vmul.f32 %v778_v58, %v41_v56 }
  0xa1   :  { %v160_v60 = vpop.permute.xlu1 %159  ;;  %v222_v0 = vadd.f32 %v206_v62, %v122_v59 }
  0xa2   :  { %v46_v61 = vpop.permute.xlu0 %45  ;;  %v211_v22 = vmul.f32 %v776_v57, %v160_v60 }
  0xa3   :  { %v123_v1 = vmul.f32 %v778_v58, %v46_v61  ;;  %v334_v9 = vadd.f32 %v257_v47, %v222_v0 }
  0xa4   :  { %v227_v31 = vadd.f32 %v211_v22, %v127_v27 }
  0xa5   :  { %v223_v8 = vadd.f32 %v207_v4, %v123_v1  ;;  %v350_v17 = vmax.f32 %v334_v9, 0.0  ;;  %v214_v1 = vmul.f32 %v776_v57, %v762_v42 }
  0xa6   :  { %v51_v2 = vpop.permute.xlu0 %50  ;;  %v267_v3 = vpop.permute.xlu1 %266 }
  0xa7   :  { %v124_v5 = vmul.f32 %v778_v58, %v51_v2 }
  0xa9   :  { %v224_v7 = vadd.f32 %v208_v63, %v124_v5 }
  0xaa   :  { %v262_v10 = vpop.permute.xlu0 %261  ;;  %v71_v11 = vpop.permute.xlu1 %70 }
  0xab   :  { %v335_v13 = vadd.f32 %v262_v10, %v223_v8  ;;  %v336_v14 = vadd.f32 %v267_v3, %v224_v7  ;;  %v128_v47 = vmul.f32 %v778_v58, %v71_v11 }
  0xad   :  { %v351_v15 = vmax.f32 %v335_v13, 0.0  ;;  %v352_v23 = vmax.f32 %v336_v14, 0.0  ;;  %v228_v54 = vadd.f32 %v212_v46, %v128_v47 }
  0xae   :  { %v272_v18 = vpop.permute.xlu0 %271  ;;  %v76_v19 = vpop.permute.xlu1 %75 }
  0xaf   :  { %v337_v20 = vadd.f32 %v272_v18, %v225_v16  ;;  %v526_v21 = vpack.c.bf16 %v351_v15, %v350_v17  ;;  %v129_v44 = vmul.f32 %v778_v58, %v76_v19  ;;  %v216_v19 = vmul.f32 %v776_v57, %v767_v45 }
  0xb1   :  { %v353_v24 = vmax.f32 %v337_v20, 0.0  ;;  %527 = vmatprep.subr.bf16.mxu0 %v526_v21 }
  0xb2   :  { %529 = vmatpush3.bf16.msra.mxu0 %v526_v21  ;;  %v282_v30 = vpop.permute.xlu0 %281 }
  0xb3   :  { %v530_v28 = vpack.c.bf16 %v353_v24, %v352_v23  ;;  %v168_v29 = vpop.permute.xlu1 %167  ;;  %v339_v32 = vadd.f32 %v282_v30, %v227_v31 }
  0xb4   :  { %v213_v43 = vmul.f32 %v776_v57, %v168_v29 }
  0xb5   :  { %531 = vmatprep.subr.bf16.mxu0 %v530_v28  ;;  %v355_v36 = vmax.f32 %v339_v32, 0.0 }
  0xb6   :  { %533 = vmatpush3.bf16.msra.mxu0 %v530_v28  ;;  %v229_v49 = vadd.f32 %v213_v43, %v129_v44  ;;  %v292_v52 = vpop.permute.xlu0 %291  ;;  %v220_v43 = vmul.f32 %v776_v57, %v771_v51  ;;  %v367_v51 = vld [vmem:[%s835_s3 + $0x8] sm:$0xff] }
  0xb8   :  { %v277_v34 = vpop.permute.xlu1 %276  ;;  %v341_v53 = vadd.f32 %v292_v52, %v229_v49 }
  0xb9   :  { %v338_v35 = vadd.f32 %v277_v34, %v226_v33  ;;  %v218_v34 = vmul.f32 %v776_v57, %v769_v48 }
  0xba   :  { %v357_v59 = vmax.f32 %v341_v53, 0.0  ;;  %v302_v5 = vpop.permute.xlu0 %301 }
  0xbb   :  { %v354_v38 = vmax.f32 %v338_v35, 0.0 }
  0xbc   :  { %v81_v40 = vpop.permute.xlu1 %80 }
  0xbd   :  { %v534_v41 = vpack.c.bf16 %v355_v36, %v354_v38  ;;  %v130_v2 = vmul.f32 %v778_v58, %v81_v40 }
  0xbe   :  { %v312_v20 = vpop.permute.xlu0 %311 }
  0xbf   :  { %535 = vmatprep.subr.bf16.mxu0 %v534_v41  ;;  %v230_v7 = vadd.f32 %v214_v1, %v130_v2 }
  0xc0   :  { %v86_v37 = vpop.permute.xlu1 %85  ;;  %537 = vmatpush3.bf16.msra.mxu0 %v534_v41 }
  0xc1   :  { %v131_v39 = vmul.f32 %v778_v58, %v86_v37 }
  0xc2   :  { %v322_v35 = vpop.permute.xlu0 %321 }
  0xc5   :  { %v176_v50 = vpop.permute.xlu1 %175 }
  0xc6   :  { %v215_v0 = vmul.f32 %v776_v57, %v176_v50 }
  0xc8   :  { %v231_v3 = vadd.f32 %v215_v0, %v131_v39 }
  0xca   :  { %v287_v55 = vpop.permute.xlu1 %286  ;;  %v343_v6 = vadd.f32 %v302_v5, %v231_v3 }
  0xcb   :  { %v340_v56 = vadd.f32 %v287_v55, %v228_v54 }
  0xcc   :  { %v359_v10 = vmax.f32 %v343_v6, 0.0 }
  0xcd   :  { %v356_v60 = vmax.f32 %v340_v56, 0.0 }
  0xce   :  { %v91_v61 = vpop.permute.xlu1 %90 }
  0xcf   :  { %v538_v62 = vpack.c.bf16 %v357_v59, %v356_v60  ;;  %v132_v16 = vmul.f32 %v778_v58, %v91_v61 }
  0xd1   :  { %539 = vmatprep.subr.bf16.mxu0 %v538_v62  ;;  %v232_v22 = vadd.f32 %v216_v19, %v132_v16 }
  0xd2   :  { %v96_v63 = vpop.permute.xlu1 %95  ;;  %541 = vmatpush3.bf16.msra.mxu0 %v538_v62  ;;  %v373_v62 = vpop.permute.xlu0 %372 }
  0xd3   :  { %v133_v42 = vmul.f32 %v778_v58, %v96_v63 }
  0xd7   :  { %v184_v4 = vpop.permute.xlu1 %183 }
  0xd8   :  { %v217_v15 = vmul.f32 %v776_v57, %v184_v4 }
  0xda   :  { %v233_v17 = vadd.f32 %v217_v15, %v133_v42 }
  0xdc   :  { %v297_v8 = vpop.permute.xlu1 %296  ;;  %v345_v21 = vadd.f32 %v312_v20, %v233_v17 }
  0xdd   :  { %v342_v9 = vadd.f32 %v297_v8, %v230_v7 }
  0xde   :  { %v361_v25 = vmax.f32 %v345_v21, 0.0 }
  0xdf   :  { %v358_v11 = vmax.f32 %v342_v9, 0.0 }
  0xe0   :  { %v101_v12 = vpop.permute.xlu1 %100 }
  0xe1   :  { %v542_v13 = vpack.c.bf16 %v359_v10, %v358_v11  ;;  %v134_v32 = vmul.f32 %v778_v58, %v101_v12 }
  0xe3   :  { %543 = vmatprep.subr.bf16.mxu0 %v542_v13  ;;  %v234_v38 = vadd.f32 %v218_v34, %v134_v32 }
  0xe4   :  { %v106_v14 = vpop.permute.xlu1 %105  ;;  %545 = vmatpush3.bf16.msra.mxu0 %v542_v13 }
  0xe5   :  { %v135_v31 = vmul.f32 %v778_v58, %v106_v14 }
  0xe9   :  { %v192_v18 = vpop.permute.xlu1 %191 }
  0xea   :  { %v219_v30 = vmul.f32 %v776_v57, %v192_v18 }
  0xec   :  { %v235_v33 = vadd.f32 %v219_v30, %v135_v31 }
  0xee   :  { %v307_v23 = vpop.permute.xlu1 %306  ;;  %v347_v36 = vadd.f32 %v322_v35, %v235_v33 }
  0xef   :  { %v344_v24 = vadd.f32 %v307_v23, %v232_v22 }
  0xf0   :  { %v363_v47 = vmax.f32 %v347_v36, 0.0 }
  0xf1   :  { %v360_v26 = vmax.f32 %v344_v24, 0.0 }
  0xf2   :  { %v111_v27 = vpop.permute.xlu1 %110 }
  0xf3   :  { %v546_v28 = vpack.c.bf16 %v361_v25, %v360_v26  ;;  %v136_v41 = vmul.f32 %v778_v58, %v111_v27 }
  0xf5   :  { %547 = vmatprep.subr.bf16.mxu0 %v546_v28  ;;  %v236_v53 = vadd.f32 %v220_v43, %v136_v41 }
  0xf6   :  { %v116_v29 = vpop.permute.xlu1 %115  ;;  %549 = vmatpush3.bf16.msra.mxu0 %v546_v28 }
  0xf7   :  { %v137_v50 = vmul.f32 %v778_v58, %v116_v29 }
  0xfb   :  { %v200_v45 = vpop.permute.xlu1 %199 }
  0xfc   :  { %v221_v44 = vmul.f32 %v776_v57, %v200_v45 }
  0xfe   :  { %v237_v54 = vadd.f32 %v221_v44, %v137_v50 }
 0x100   :  { %v317_v40 = vpop.permute.xlu1 %316 }
 0x101   :  { %v346_v37 = vadd.f32 %v317_v40, %v234_v38 }
 0x103   :  { %v362_v46 = vmax.f32 %v346_v37, 0.0 }
 0x104   :  { %v327_v49 = vpop.permute.xlu1 %326 }
 0x105   :  { %v550_v52 = vpack.c.bf16 %v363_v47, %v362_v46  ;;  %v348_v48 = vadd.f32 %v327_v49, %v236_v53 }
 0x107   :  { %551 = vmatprep.subr.bf16.mxu0 %v550_v52  ;;  %v364_v59 = vmax.f32 %v348_v48, 0.0 }
 0x108   :  { %v332_v55 = vpop.permute.xlu1 %331  ;;  %553 = vmatpush3.bf16.msra.mxu0 %v550_v52 }
 0x109   :  { %v349_v56 = vadd.f32 %v332_v55, %v237_v54 }
 0x10b   :  { %v365_v60 = vmax.f32 %v349_v56, 0.0 }
 0x10c   :  { %v378_v57 = vpop.permute.xlu1 %377 }
 0x10d   :  { %v554_v61 = vpack.c.bf16 %v365_v60, %v364_v59 }
 0x10f   :  { %555 = vmatprep.subr.bf16.mxu0 %v554_v61 }
 0x110   :  { %557 = vmatpush3.bf16.msra.mxu0 %v554_v61 }
 0x113   :  { %524 = vmatmul.mubr.f32.vlgmr.msra.gmra.mrb[0].mxu0 %v367_v51 }
 0x1e6   :  { %v525_v58 = vpop.f32.mrb[0].mxu0 }
 0x1e7   :  { %v452_v63 = vadd.f32 %v525_v58, %v378_v57  ;;  %v446_v0 = vpop.f32.mrb[1].mxu0 }
 0x1e8   :  { %v447_v39 = vadd.f32 %v446_v0, %v373_v62 }
 0x1e9   :  { %456 = vst [vmem:[#allocation2 + $0x8] sm:$0xff] %v452_v63 }
 0x1ea   :  { %455 = vst [vmem:[#allocation2] sm:$0xff] %v447_v39 }
 0x1eb   :  { %592 = shalt.err (!%p589_p4)
}
 0x1ec   :  { %s593_s17 = scalar_lea.hbm %s837_s5, 256 }
 0x1ed   :  { %p594_p5 = scmp.ne.s32.totalorder %s837_s5, %s593_s17  ;;  %p597_p6 = scmp.lt.u32.totalorder %s593_s17, %s837_s5 }
 0x1ef   :  { %p599_p7 = pnand %p597_p6, %p594_p5 }
 0x1f1   :  { %602 = shalt.err (!%p599_p7)
}
 0x1f2   :  { %s608_s22 = smov 128   ;;  %s609_s23 = smov 8  }
 0x1f3   :  { %468 = dma.vmem_to_hbm [thread:$0]  %s463_s14, 256, %s837_s5, [#allocation3], %s608_s22, %s608_s22, %s609_s23  }
 0x1f4   :  { %603 = dma.done.wait [#allocation3], 256  }
 0x1f5   :  { %604 = vsyncadd [#allocation3], 4294967040 }
 0x1f6   :  { %472 = vsyncpa [#allocation3], 1 }

</bundles_post_ra>
